<compile_context>
chip_gen: v5e
topology: v5e:2x2
jax: 0.10.0
libtpu: 0.0.40
codegen_flags: <defaults>
</compile_context>

<pallas_src>
import math

import jax
import jax.numpy as jnp
from jax.experimental import pallas as pl
from jax.experimental.pallas import tpu as pltpu


def _add_pe_kernel(emb_ref, pe_ref, out_ref):
    # emb_ref: (tB, tT, Dw); pe_ref: (1 or tB, tT, Dw); out_ref: (tB, tT, Dw).
    out_ref[...] = (emb_ref[...] + pe_ref[...]).astype(out_ref.dtype)


def _pick_tiles(B, Tw, Dw, itemsize, sublane, target_bytes):
    """Pick (tB, tT) so one emb block ~= target_bytes, tT sublane-aligned."""
    row_bytes = max(Dw * itemsize, 1)
    rows_cap = max(1, target_bytes // (B * row_bytes))
    if rows_cap >= Tw:
        return B, Tw                                   # whole seq axis in one block
    if rows_cap >= sublane:
        return B, max(sublane, rows_cap - rows_cap % sublane)
    # even `sublane` rows of the full batch overflow the target: tile batch too
    tT = Tw if Tw < sublane else sublane
    tB = max(1, min(B, target_bytes // (tT * row_bytes)))
    return tB, tT


def learned_positional_encoding(emb, pe_table, positions=None):
    """pe_table[positions] + emb  (positions default to arange(seq_len)).

    emb: (batch, seq_len, dim); pe_table: (max_len, dim). Matches the PyTorch
    LearnedPositionalEncoding.forward (gathered PE rows broadcast over batch).
    """
    B, T, D = emb.shape
    out_dtype = jnp.result_type(emb.dtype, pe_table.dtype)   # PyTorch promotion
    pe_table = pe_table.astype(out_dtype)

    # ---- select the PE rows (indexing only; the bandwidth-heavy add is Pallas) ----
    if positions is None:
        pe_rows = pe_table[:T][None]                              # (1, T, D), shared
    else:
        positions = jnp.asarray(positions).astype(jnp.int32)
        if positions.ndim == 2 and positions.shape[0] == B and B > 1:
            pe_rows = jnp.take(pe_table, positions, axis=0)       # (B, T, D) per-batch
        else:
            pe_rows = jnp.take(pe_table, positions.reshape(-1), axis=0)[None]  # (1,T,D)
    PB = pe_rows.shape[0]

    # ---- lane-dense folding: merge k adjacent seq rows so the last dim % 128 == 0.
    # Row-major merges of adjacent dims are free; pad T up to a multiple of k if
    # needed so output stores stay unmasked (biggest measured lever for narrow D).
    k = 128 // math.gcd(D, 128)
    pad_T = (-T) % k if k > 1 else 0
    if pad_T:
        emb = jnp.pad(emb, ((0, 0), (0, pad_T), (0, 0)))
        pe_rows = jnp.pad(pe_rows, ((0, 0), (0, pad_T), (0, 0)))
    Tp = T + pad_T
    if k > 1:
        Tw, Dw = Tp // k, k * D
        emb_w = emb.reshape(B, Tw, Dw)
        pe_w = pe_rows.reshape(PB, Tw, Dw)
    else:
        emb_w, pe_w, Tw, Dw = emb, pe_rows, T, D

    # ---- per-chip VMEM budget & tile sizing -----------------------------------
    in_item = emb.dtype.itemsize
    out_item = jnp.dtype(out_dtype).itemsize
    sublane = {4: 8, 2: 16, 1: 32}.get(min(in_item, out_item), 8)

    try:
        vmem_cap = pltpu.get_tpu_info().vmem_capacity_bytes
    except Exception:
        vmem_cap = 64 * 1024 * 1024
    # 48 MiB scoped limit on 64 MiB-VMEM chips (v7x), 64 MiB on 128 MiB chips.
    vmem_limit = 48 * 1024 * 1024 if vmem_cap <= 64 * 1024 * 1024 else 64 * 1024 * 1024
    # Whole pipelined working set: 2x emb + 2x out + 2x pe (pe bounded by emb size).
    streams = 2.0 * (1.0 + out_item / in_item) + 2.0
    target = int(0.6 * vmem_limit / streams)
    target = max(512 * 1024, min(target, 8 * 1024 * 1024))

    tB, tT = _pick_tiles(B, Tw, Dw, in_item, sublane, target)

    # Give the v7x megacore at least two parallel steps when it is cheap to do so.
    if pl.cdiv(B, tB) * pl.cdiv(Tw, tT) == 1:
        if tT >= 2 * sublane:
            tT = ((tT // 2 + sublane - 1) // sublane) * sublane
        elif tB >= 2:
            tB = (tB + 1) // 2

    grid = (pl.cdiv(B, tB), pl.cdiv(Tw, tT))

    if PB == 1:
        pe_block = (1, tT, Dw)
        pe_index = lambda b, t: (0, t, 0)
    else:
        pe_block = (tB, tT, Dw)
        pe_index = lambda b, t: (b, t, 0)

    out_w = pl.pallas_call(
        _add_pe_kernel,
        out_shape=jax.ShapeDtypeStruct((B, Tw, Dw), out_dtype),
        grid=grid,
        in_specs=[
            pl.BlockSpec((tB, tT, Dw), lambda b, t: (b, t, 0)),   # emb tile
            pl.BlockSpec(pe_block, pe_index),                     # matching PE rows
        ],
        out_specs=pl.BlockSpec((tB, tT, Dw), lambda b, t: (b, t, 0)),
        compiler_params=pltpu.CompilerParams(
            dimension_semantics=("parallel", "parallel"),   # each tile written once
            vmem_limit_bytes=vmem_limit,
        ),
    )(emb_w, pe_w)

    out = out_w.reshape(B, Tp, D)
    if pad_T:
        out = out[:, :T, :]
    return out


if __name__ == "__main__":
    # Small shapes consistent with the module's forward.
    batch, seq_len, dim, max_len = 2, 8, 32, 64

    key = jax.random.PRNGKey(0)
    k_emb, k_pe = jax.random.split(key)

    emb = jax.random.normal(k_emb, (batch, seq_len, dim), dtype=jnp.float32)
    # nn.Embedding default init ~ N(0, 1); deterministic synthetic weights.
    pe_table = jax.random.normal(k_pe, (max_len, dim), dtype=jnp.float32)

    # Default-positions path (the module's standard forward).
    out = jax.block_until_ready(learned_positional_encoding(emb, pe_table))
    ref = pe_table[jnp.arange(seq_len)][None, :, :] + emb
    assert out.shape == (batch, seq_len, dim)
    assert jnp.allclose(out, ref, atol=1e-6, rtol=1e-6)

    # Explicit shared-positions path.
    pos = jnp.array([3, 1, 4, 1, 5, 9, 2, 6], dtype=jnp.int32)
    out_p = jax.block_until_ready(learned_positional_encoding(emb, pe_table, pos))
    ref_p = pe_table[pos][None, :, :] + emb
    assert jnp.allclose(out_p, ref_p, atol=1e-6, rtol=1e-6)

    # Per-batch positions path (shape (B, T)).
    pos_b = jnp.stack([pos, (pos + 7) % max_len], axis=0)
    out_b = jax.block_until_ready(learned_positional_encoding(emb, pe_table, pos_b))
    ref_b = pe_table[pos_b] + emb
    assert jnp.allclose(out_b, ref_b, atol=1e-6, rtol=1e-6)

    print("KERNEL_OK")
</pallas_src>

<mosaic_0001>
module attributes {stable_mosaic.version = 11 : i64} {
  func.func @_add_pe_kernel(%arg0: i32, %arg1: i32, %arg2: memref<1x2x128xf32, #tpu.memory_space<vmem>>, %arg3: memref<1x2x128xf32, #tpu.memory_space<vmem>>, %arg4: memref<1x2x128xf32, #tpu.memory_space<vmem>>) attributes {dimension_semantics = [#tpu.dimension_semantics<parallel>, #tpu.dimension_semantics<parallel>], iteration_bounds = array<i64: 2, 1>, scalar_prefetch = 0 : i64, scratch_operands = 0 : i64, tpu.core_type = #tpu.core_type<tc>, window_params = [{transform_indices = @transform_0, window_bounds = array<i64: 1, 2, 128>}, {transform_indices = @transform_1, window_bounds = array<i64: 1, 2, 128>}, {transform_indices = @transform_2, window_bounds = array<i64: 1, 2, 128>}]} {
    %c0 = arith.constant 0 : index
    %c0_0 = arith.constant 0 : index
    %c0_1 = arith.constant 0 : index
    %0 = vector.load %arg2[%c0, %c0_0, %c0_1] : memref<1x2x128xf32, #tpu.memory_space<vmem>>, vector<1x2x128xf32>
    %c0_2 = arith.constant 0 : index
    %c0_3 = arith.constant 0 : index
    %c0_4 = arith.constant 0 : index
    %1 = vector.load %arg3[%c0_2, %c0_3, %c0_4] : memref<1x2x128xf32, #tpu.memory_space<vmem>>, vector<1x2x128xf32>
    %2 = arith.addf %0, %1 : vector<1x2x128xf32>
    %c0_5 = arith.constant 0 : index
    %c0_6 = arith.constant 0 : index
    %c0_7 = arith.constant 0 : index
    %3 = vector.load %arg4[%c0_5, %c0_6, %c0_7] : memref<1x2x128xf32, #tpu.memory_space<vmem>>, vector<1x2x128xf32>
    tpu.vector_store %arg4[%c0_5, %c0_6, %c0_7], %2 {strides = array<i32>} : memref<1x2x128xf32, #tpu.memory_space<vmem>>, vector<1x2x128xf32>,
    return
  }
  func.func @transform_0(%arg0: i32, %arg1: i32) -> (i32, i32, i32) {
    %c0_i32 = arith.constant 0 : i32
    %c0_i32_0 = arith.constant 0 : i32
    return %arg0, %arg1, %c0_i32 : i32, i32, i32
  }
  func.func @transform_1(%arg0: i32, %arg1: i32) -> (i32, i32, i32) {
    %c0_i32 = arith.constant 0 : i32
    %c0_i32_0 = arith.constant 0 : i32
    %c0_i32_1 = arith.constant 0 : i32
    return %c0_i32, %arg1, %c0_i32_0 : i32, i32, i32
  }
  func.func @transform_2(%arg0: i32, %arg1: i32) -> (i32, i32, i32) {
    %c0_i32 = arith.constant 0 : i32
    %c0_i32_0 = arith.constant 0 : i32
    return %arg0, %arg1, %c0_i32 : i32, i32, i32
  }
}

</mosaic_0001>

<bundles_post_ra>
// kernel: tpu_custom_call.1
= control target key start
LH: loop header
LB: loop body
LE: loop exit
PB: predicated region body
PF: predicated region fallthrough
CT: control target
= control target key end

     0   :  { %7 = vsyncpa [#allocation3], 0  ;;  %s714_s0 = inlined_call_operand.hbm [shape: f32[2,2,128], index: 0, kind: input, shape index: {}]   ;;  %s715_s1 = inlined_call_operand.hbm [shape: f32[1,2,128], index: 1, kind: input, shape index: {}]   ;;  %s716_s2 = inlined_call_operand.hbm [shape: f32[2,2,128], index: 2, kind: output, shape index: {}]  }
   0x1   :  { %9 = vsyncpa [#allocation3 + $0x1], 0 }
   0x2   :  { %10 = vsyncpa [#allocation6], 0 }
   0x3   :  { %11 = vsyncpa [#allocation4], 0 }
   0x4   :  { %13 = vsyncpa [#allocation4 + $0x1], 0  ;;  %s565_s9 = smov 0   ;;  %s567_s10 = smov 0  }
   0x5   :  { %s569_s11 = smov 0   ;;  %s571_s12 = smov 0  }
   0x6   :  { %s573_s13 = smov 0   ;;  %s575_s14 = smov 0  }
   0x7 LB: > { %s313_s15 = sadd.s32 4294967295, %s547_s14   ;;  %s314_s16 = sadd.s32 4294967294, %s547_s14   ;;  %s547_s14 = sphi %s575_s14, %s19_s14   ;;  %s543_s13 = sphi %s573_s13, %s728_s13   ;;  %s539_s12 = sphi %s571_s12, %s727_s12   ;;  %s535_s11 = sphi %s569_s11, %s726_s11   ;;  %s531_s10 = sphi %s567_s10, %s725_s10   ;;  %s527_s9 = sphi %s565_s9, %s724_s9  }
   0x8   : > { %p53_p0 = scmp.ne.s32.totalorder %s531_s10, %s527_s9  ;;  %p599_p1 = scmp.eq.s32.totalorder %s313_s15, 0 }
   0x9   : > { %p603_p2 = scmp.eq.s32.totalorder %s313_s15, 1  ;;  %p111_p3 = scmp.eq.s32.totalorder %s314_s16, 1 }
   0xa   : > { %p609_p4 = por %p599_p1, %p53_p0  ;;  %p315_p5 = scmp.ge.s32.totalorder %s547_s14, 1 }
   0xb   : > { %p614_p6 = por %p111_p3, %p53_p0  ;;  %p118_p7 = scmp.lt.s32.totalorder %s547_s14, 3 }
   0xc   : > { %s132_s23 = sshll.u32 %s715_s1, 4  ;;  %p317_p9 = scmp.ge.s32.totalorder %s547_s14, 2  ;;  %s133_s23 = int_to_ptr.hbm [resolvable:$true] %s132_s23 }
   0xd   : > { %p622_p8 = pnand %p315_p5, %p118_p7  ;;  %s549_s25 = smov [#allocation5]  }
   0xe   : > { %s134_s26 = sshll.u32 %s549_s25, 4  ;;  %s31_s27 = sadd.s32 1, %s543_s13  ;;  %s135_s26 = int_to_ptr.vmem [resolvable:$true] %s134_s26 }
   0xf   : > { %p336_p10 = pneg %p622_p8  ;;  %p33_p12 = scmp.ge.s32.totalorder %s31_s27, 2 }
  0x10   : > { %s40_s28 = sadd.s32 1, %s535_s11  ;;  %p47_p13 = scmp.ne.s32.totalorder %s535_s11, %s531_s10 }
  0x11   : > { %p337_p11 = pnand %p336_p10, %p599_p1  ;;  %p48_p0 = scmp.eq.s32.totalorder %s547_s14, 0 }
  0x12   : > { %s730_s27 = smov (%p33_p12, %s31_s27), 0  ;;  %p644_p5 = por %p603_p2, %p47_p13 }
  0x13   : > { %339 = dma.hbm_to_vmem [thread:$0]  (!%p337_p11), %s133_s23, 32, %s135_s26, [#allocation6]  }
  0x14   : > { %p638_p3 = por %p48_p0, %p47_p13  ;;  %s35_s3 = ssub.s32 %s543_s13, %s730_s27 }
  0x15   : > { %p349_p7 = scmp.lt.s32.totalorder %s547_s14, 2  ;;  %p38_p10 = scmp.eq.s32.totalorder %s35_s3, 0 }
  0x16   : > { %s145_s4 = sand.u32 1, %s535_s11   ;;  %s319_s7 = sshll.u32 %s543_s13, 1 }
  0x17   : > { %s318_s5 = sshll.u32 %s145_s4, 1  ;;  %s154_s16 = scalar_lea.hbm %s714_s0, %s319_s7 }
  0x18   : > { %s653_s6 = scalar_select %p38_p10, %s535_s11, %s40_s28  }
  0x19   : > { %s149_s21 = scalar_lea.vmem [#allocation2], %s318_s5  ;;  %s156_s18 = sshll.u32 %s154_s16, 4  ;;  %s157_s18 = int_to_ptr.hbm [resolvable:$true] %s156_s18 }
  0x1a   : > { %s158_s22 = sshll.u32 %s149_s21, 4  ;;  %p341_p2 = pnand %p349_p7, %p638_p3  ;;  %s159_s22 = int_to_ptr.vmem [resolvable:$true] %s158_s22 }
  0x1b   : > { %s146_s23 = scalar_lea.sflag [#allocation3], %s145_s4  ;;  %167 = sbr.rel (%p622_p8) target bundleno = 50 (0x32), region = 28 }
  0x1c   : > { %343 = dma.hbm_to_vmem [thread:$0]  (!%p341_p2), %s157_s18, 32, %s159_s22, %s146_s23  }
  0x1d   : > { %s664_s25 = sand.u32 (!%p622_p8), 1, %s531_s10  }
  0x1e   : > { %s321_s26 = sshll.u32 (!%p622_p8), %s664_s25, 1  ;;  %s170_s28 = scalar_lea.sflag (!%p622_p8), [#allocation3], %s664_s25 }
  0x1f   : > { %s173_s3 = scalar_lea.vmem (!%p622_p8), [#allocation2], %s321_s26 }
  0x20   : > { %514 = dma.done.wait (%p609_p4), %s170_s28, 32  }
  0x21   : > { %516 = vsyncadd (%p609_p4), %s170_s28, 4294967264 }
  0x22   : > { %518 = dma.done.wait (%p599_p1), [#allocation6], 32  }
  0x23   : > { %520 = vsyncadd (%p599_p1), [#allocation6], 4294967264  ;;  %s325_s24 = sshll.u32 %s539_s12, 1  ;;  %s199_s7 = scalar_lea.vmem [#allocation7], %s321_s26  ;;  %v200_v0 = vld [vmem:[%s173_s3] sm:$0x3] }
  0x24   : > { %s216_s5 = scalar_lea.hbm %s716_s2, %s325_s24  ;;  %s218_s8 = sshll.u32 %s199_s7, 4  ;;  %v201_v1 = vld [vmem:[#allocation5] sm:$0x3]  ;;  %s219_s8 = int_to_ptr.vmem [resolvable:$true] %s218_s8 }
  0x25   : > { %s220_s15 = sshll.u32 %s216_s5, 4  ;;  %v202_v2 = vadd.f32 %v201_v1, %v200_v0  ;;  %s205_s19 = scalar_lea.sflag [#allocation4], %s664_s25  ;;  %s221_s15 = int_to_ptr.hbm [resolvable:$true] %s220_s15 }
  0x26   : > { %s475_s17 = sshra.s32 %s221_s15, 4  ;;  %s481_s22 = scalar_lea.hbm %s716_s2, 4  ;;  %s476_s17 = int_to_ptr.hbm [resolvable:$true] %s475_s17 }
  0x27   : > { %203 = vst [vmem:[%s199_s7] sm:$0x3] %v202_v2  ;;  %s477_s16 = scalar_lea.hbm %s476_s17, 2  ;;  %p482_p11 = scmp.lt.s32.totalorder %s476_s17, %s716_s2 }
  0x28   : > { %p478_p1 = scmp.ne.s32.totalorder %s476_s17, %s477_s16  ;;  %p483_p12 = scmp.lt.s32.totalorder %s481_s22, %s477_s16 }
  0x2a   : > { %p479_p4 = pnand %p478_p1, %p644_p5  ;;  %p484_p13 = por %p483_p12, %p482_p11 }
  0x2c   : > { %p480_p8 = pneg %p479_p4 }
  0x2e   : > { %p485_p0 = pnand %p484_p13, %p480_p8 }
  0x30   : > { %488 = shalt.err (!%p485_p0)
}
  0x31   : > { %334 = dma.vmem_to_hbm [thread:$0]  (%p644_p5), %s219_s8, 32, %s221_s15, %s205_s19  }
  0x32 PF: > { %s232_s25 = sand.u32 1, %s527_s9   ;;  %p345_p3 = pnand %p317_p9, %p614_p6 }
  0x33   : > { %s233_s26 = scalar_lea.sflag [#allocation4], %s232_s25 }
  0x34   : > { %p346_p7 = pneg %p345_p3 }
  0x36   : > { %522 = dma.done.wait (%p346_p7), %s233_s26, 32  }
  0x37   : > { %524 = vsyncadd (%p346_p7), %s233_s26, 4294967264  ;;  %s19_s14 = sadd.s32 1, %s547_s14   ;;  %s724_s9 = smov %s531_s10 }
  0x38   : > { %p16_p10 = scmp.ge.s32.totalorder %s19_s14, 4   ;;  %s725_s10 = smov %s535_s11 }
  0x39   : > { %s726_s11 = smov %s653_s6  ;;  %s727_s12 = smov %s543_s13 }
  0x3a   : > { %s728_s13 = smov %s730_s27  ;;  %18 = sbr.rel (!%p16_p10) target bundleno = 7 (0x7), region = 78 }
  0x3f   :  { %239 = vsyncpa [#allocation3], 1 }
  0x40   :  { %241 = vsyncpa [#allocation3 + $0x1], 1 }
  0x41   :  { %242 = vsyncpa [#allocation6], 1 }
  0x42   :  { %243 = vsyncpa [#allocation4], 1 }
  0x43   :  { %245 = vsyncpa [#allocation4 + $0x1], 1 }

</bundles_post_ra>
